<compile_context>
chip_gen: v5e
topology: v5e:2x2
jax: 0.10.0
libtpu: 0.0.40
codegen_flags: <defaults>
</compile_context>

<pallas_src>
import functools

import jax
import jax.numpy as jnp
from jax import lax
from jax.experimental import pallas as pl
from jax.experimental.pallas import tpu as pltpu


def _round_up(x, m):
    return (x + m - 1) // m * m


def bert_self_output_kernel(x_ref, res_ref, w_ref, params_ref, o_ref, *,
                            eps, mxu_dtype):
    # x_ref/res_ref/o_ref: (TM, H); w_ref: (H_out, H_in) PyTorch layout (mxu dtype)
    # params_ref: (3, H) f32 = [bias; gamma; beta]
    bias = params_ref[0:1, :]      # loop-invariant params, hoisted once, f32
    gamma = params_ref[1:2, :]
    beta = params_ref[2:3, :]

    # MXU matmul in bf16 with f32 accumulation; contract on W's 'in' axis so
    # the PyTorch [out, in] weight is consumed directly (no wrapper transpose).
    x = x_ref[...].astype(mxu_dtype)
    y = lax.dot_general(x, w_ref[...],
                        dimension_numbers=(((1,), (1,)), ((), ())),
                        preferred_element_type=jnp.float32)

    # TODO(synk): dropout omitted (inference mode / identity).
    z = y + bias + res_ref[...].astype(jnp.float32)

    # LayerNorm over the hidden (lane) axis, f32 math, biased variance.
    mean = jnp.mean(z, axis=-1, keepdims=True)
    zc = z - mean
    var = jnp.mean(zc * zc, axis=-1, keepdims=True)
    inv = lax.rsqrt(var + eps)
    o_ref[...] = (zc * inv * gamma + beta).astype(o_ref.dtype)


def bert_self_output(hidden_states, input_tensor, w, b, gamma, beta,
                     eps=1e-12, tm=256, mxu_dtype=jnp.bfloat16):
    """hidden_states, input_tensor: [B, S, H]; w: [H, H] in PyTorch Linear
    layout (weight[out, in]); b, gamma, beta: [H]."""
    B, S, H = hidden_states.shape
    rows = B * S
    act_dtype = hidden_states.dtype

    # ---- tiling: big row tile, pad the ragged tail instead of shrinking tm ----
    tm = max(8, _round_up(tm, 8))
    tm_eff = min(tm, _round_up(rows, 8))          # never exceed the (padded) rows
    padded_rows = _round_up(rows, tm_eff)

    x2 = hidden_states.reshape(rows, H)
    r2 = input_tensor.reshape(rows, H)
    if padded_rows != rows:
        pad = padded_rows - rows
        x2 = jnp.pad(x2, ((0, pad), (0, 0)))
        r2 = jnp.pad(r2, ((0, pad), (0, 0)))

    # Weight kept in [out, in] layout (no transpose); cast once to the MXU dtype.
    # In production, pre-cast at parameter-load time so this is a no-op per call.
    w_mxu = jnp.asarray(w).astype(mxu_dtype)

    # Fuse bias / LN gamma / LN beta into one (3, H) f32 block -> single DMA.
    params = jnp.stack([jnp.asarray(b, jnp.float32),
                        jnp.asarray(gamma, jnp.float32),
                        jnp.asarray(beta, jnp.float32)], axis=0)

    grid = (padded_rows // tm_eff,)

    act_bytes = jnp.dtype(act_dtype).itemsize
    w_bytes = jnp.dtype(mxu_dtype).itemsize
    # Double-buffered activation tiles + (possibly double-buffered) weight + params.
    vmem_est = (2 * 3 * tm_eff * H * max(act_bytes, 4)
                + 2 * H * H * w_bytes + 2 * 3 * H * 4 + (1 << 20))
    # Keep under v7x's 64 MiB physical VMEM; v5e/v6e have 128 MiB so this is safe.
    vmem_limit = int(min(max(2 * vmem_est, 32 << 20), 64 << 20))

    cost = pl.CostEstimate(
        flops=2 * padded_rows * H * H + 10 * padded_rows * H,
        transcendentals=padded_rows,
        bytes_accessed=3 * rows * H * act_bytes + H * H * w_bytes + 3 * H * 4,
    )

    kernel = functools.partial(bert_self_output_kernel,
                               eps=float(eps), mxu_dtype=mxu_dtype)

    out2 = pl.pallas_call(
        kernel,
        out_shape=jax.ShapeDtypeStruct((padded_rows, H), act_dtype),
        grid_spec=pltpu.PrefetchScalarGridSpec(
            num_scalar_prefetch=0,
            grid=grid,
            in_specs=[
                pl.BlockSpec((tm_eff, H), lambda i: (i, 0)),   # x row tile
                pl.BlockSpec((tm_eff, H), lambda i: (i, 0)),   # residual row tile
                pl.BlockSpec((H, H), lambda i: (0, 0)),        # weight (resident)
                pl.BlockSpec((3, H), lambda i: (0, 0)),        # bias/gamma/beta
            ],
            out_specs=pl.BlockSpec((tm_eff, H), lambda i: (i, 0)),
        ),
        compiler_params=pltpu.CompilerParams(
            dimension_semantics=("parallel",),   # lets v7x's 2 TCs split the rows
            vmem_limit_bytes=vmem_limit),
        cost_estimate=cost,
    )(x2, r2, w_mxu, params)

    return out2[:rows].reshape(B, S, H)


def reference(hidden_states, input_tensor, w, b, gamma, beta, eps=1e-12):
    y = jnp.einsum("bsh,oh->bso", hidden_states, w) + b
    z = y + input_tensor
    mean = jnp.mean(z, axis=-1, keepdims=True)
    var = jnp.mean((z - mean) ** 2, axis=-1, keepdims=True)
    return (z - mean) / jnp.sqrt(var + eps) * gamma + beta


if __name__ == "__main__":
    key = jax.random.PRNGKey(0)
    B, S, H = 2, 8, 32
    k1, k2, k3, k4, k5, k6 = jax.random.split(key, 6)

    hidden_states = jax.random.normal(k1, (B, S, H), dtype=jnp.float32)
    input_tensor = jax.random.normal(k2, (B, S, H), dtype=jnp.float32)
    # Deterministic synthetic parameters (PyTorch Linear layout: [out, in]).
    w = jax.random.normal(k3, (H, H), dtype=jnp.float32) * 0.05
    b = jax.random.normal(k4, (H,), dtype=jnp.float32) * 0.01
    gamma = 1.0 + 0.1 * jax.random.normal(k5, (H,), dtype=jnp.float32)
    beta = 0.1 * jax.random.normal(k6, (H,), dtype=jnp.float32)

    out = bert_self_output(hidden_states, input_tensor, w, b, gamma, beta)
    out = jax.block_until_ready(out)

    ref = reference(hidden_states, input_tensor, w, b, gamma, beta)
    assert out.shape == (B, S, H)
    # bf16 MXU inputs -> slightly looser tolerance vs the f32 reference.
    assert jnp.allclose(out, ref, atol=2e-2, rtol=2e-2), "mismatch vs reference"

    print("KERNEL_OK")
</pallas_src>

<mosaic_0001>
module attributes {stable_mosaic.version = 11 : i64} {
  func.func @bert_self_output_kernel(%arg0: i32, %arg1: memref<16x32xf32, #tpu.memory_space<vmem>>, %arg2: memref<16x32xf32, #tpu.memory_space<vmem>>, %arg3: memref<32x32xbf16, #tpu.memory_space<vmem>>, %arg4: memref<3x32xf32, #tpu.memory_space<vmem>>, %arg5: memref<16x32xf32, #tpu.memory_space<vmem>>) attributes {dimension_semantics = [#tpu.dimension_semantics<parallel>], iteration_bounds = array<i64: 1>, scalar_prefetch = 0 : i64, scratch_operands = 0 : i64, tpu.core_type = #tpu.core_type<tc>, window_params = [{transform_indices = @transform_0, window_bounds = array<i64: 16, 32>}, {transform_indices = @transform_1, window_bounds = array<i64: 16, 32>}, {pipeline_mode = #tpu.pipeline_mode<synchronous>, transform_indices = @transform_2, window_bounds = array<i64: 32, 32>}, {pipeline_mode = #tpu.pipeline_mode<synchronous>, transform_indices = @transform_3, window_bounds = array<i64: 3, 32>}, {transform_indices = @transform_4, window_bounds = array<i64: 16, 32>}]} {
    %c0 = arith.constant 0 : index
    %c0_0 = arith.constant 0 : index
    %0 = vector.load %arg4[%c0, %c0_0] : memref<3x32xf32, #tpu.memory_space<vmem>>, vector<1x32xf32>
    %c1 = arith.constant 1 : index
    %c0_1 = arith.constant 0 : index
    %1 = vector.load %arg4[%c1, %c0_1] : memref<3x32xf32, #tpu.memory_space<vmem>>, vector<1x32xf32>
    %c2 = arith.constant 2 : index
    %c0_2 = arith.constant 0 : index
    %2 = vector.load %arg4[%c2, %c0_2] : memref<3x32xf32, #tpu.memory_space<vmem>>, vector<1x32xf32>
    %c0_3 = arith.constant 0 : index
    %c0_4 = arith.constant 0 : index
    %3 = vector.load %arg1[%c0_3, %c0_4] : memref<16x32xf32, #tpu.memory_space<vmem>>, vector<16x32xf32>
    %4 = arith.truncf %3 : vector<16x32xf32> to vector<16x32xbf16>
    %c0_5 = arith.constant 0 : index
    %c0_6 = arith.constant 0 : index
    %5 = vector.load %arg3[%c0_5, %c0_6] : memref<32x32xbf16, #tpu.memory_space<vmem>>, vector<32x32xbf16>
    %cst = arith.constant dense<0.000000e+00> : vector<16x32xf32>
    %6 = tpu.matmul %4, %5, %cst {dimension_numbers = #tpu.dot_dimension_numbers<[1], [1], [0], [0], [0, 0, 1, 0], [], []>} : vector<16x32xbf16>, vector<32x32xbf16>, vector<16x32xf32> -> vector<16x32xf32>
    %7 = vector.broadcast %0 : vector<1x32xf32> to vector<16x32xf32>
    %8 = arith.addf %6, %7 : vector<16x32xf32>
    %c0_7 = arith.constant 0 : index
    %c0_8 = arith.constant 0 : index
    %9 = vector.load %arg2[%c0_7, %c0_8] : memref<16x32xf32, #tpu.memory_space<vmem>>, vector<16x32xf32>
    %10 = arith.addf %8, %9 : vector<16x32xf32>
    %cst_9 = arith.constant dense<0.000000e+00> : vector<16xf32>
    %11 = vector.multi_reduction <add>, %10, %cst_9 [1] : vector<16x32xf32> to vector<16xf32>
    %12 = vector.shape_cast %11 : vector<16xf32> to vector<16x1xf32>
    %cst_10 = arith.constant 3.200000e+01 : f32
    %13 = vector.broadcast %cst_10 : f32 to vector<16x1xf32>
    %14 = arith.divf %12, %13 : vector<16x1xf32>
    %15 = vector.broadcast %14 : vector<16x1xf32> to vector<16x32xf32>
    %16 = arith.subf %10, %15 : vector<16x32xf32>
    %17 = arith.mulf %16, %16 : vector<16x32xf32>
    %cst_11 = arith.constant dense<0.000000e+00> : vector<16xf32>
    %18 = vector.multi_reduction <add>, %17, %cst_11 [1] : vector<16x32xf32> to vector<16xf32>
    %19 = vector.shape_cast %18 : vector<16xf32> to vector<16x1xf32>
    %cst_12 = arith.constant 3.200000e+01 : f32
    %20 = vector.broadcast %cst_12 : f32 to vector<16x1xf32>
    %21 = arith.divf %19, %20 : vector<16x1xf32>
    %cst_13 = arith.constant 9.99999996E-13 : f32
    %22 = vector.broadcast %cst_13 : f32 to vector<16x1xf32>
    %23 = arith.addf %21, %22 : vector<16x1xf32>
    %24 = math.rsqrt %23 : vector<16x1xf32>
    %25 = vector.broadcast %24 : vector<16x1xf32> to vector<16x32xf32>
    %26 = arith.mulf %16, %25 : vector<16x32xf32>
    %27 = vector.broadcast %1 : vector<1x32xf32> to vector<16x32xf32>
    %28 = arith.mulf %26, %27 : vector<16x32xf32>
    %29 = vector.broadcast %2 : vector<1x32xf32> to vector<16x32xf32>
    %30 = arith.addf %28, %29 : vector<16x32xf32>
    %c0_14 = arith.constant 0 : index
    %c0_15 = arith.constant 0 : index
    %31 = vector.load %arg5[%c0_14, %c0_15] : memref<16x32xf32, #tpu.memory_space<vmem>>, vector<16x32xf32>
    tpu.vector_store %arg5[%c0_14, %c0_15], %30 {strides = array<i32>} : memref<16x32xf32, #tpu.memory_space<vmem>>, vector<16x32xf32>,
    return
  }
  func.func @transform_0(%arg0: i32) -> (i32, i32) {
    %c0_i32 = arith.constant 0 : i32
    %c0_i32_0 = arith.constant 0 : i32
    return %arg0, %c0_i32 : i32, i32
  }
  func.func @transform_1(%arg0: i32) -> (i32, i32) {
    %c0_i32 = arith.constant 0 : i32
    %c0_i32_0 = arith.constant 0 : i32
    return %arg0, %c0_i32 : i32, i32
  }
  func.func @transform_2(%arg0: i32) -> (i32, i32) {
    %c0_i32 = arith.constant 0 : i32
    %c0_i32_0 = arith.constant 0 : i32
    %c0_i32_1 = arith.constant 0 : i32
    return %c0_i32, %c0_i32_0 : i32, i32
  }
  func.func @transform_3(%arg0: i32) -> (i32, i32) {
    %c0_i32 = arith.constant 0 : i32
    %c0_i32_0 = arith.constant 0 : i32
    %c0_i32_1 = arith.constant 0 : i32
    return %c0_i32, %c0_i32_0 : i32, i32
  }
  func.func @transform_4(%arg0: i32) -> (i32, i32) {
    %c0_i32 = arith.constant 0 : i32
    %c0_i32_0 = arith.constant 0 : i32
    return %arg0, %c0_i32 : i32, i32
  }
}

</mosaic_0001>

<bundles_post_ra>
// kernel: tpu_custom_call.1
= control target key start
LH: loop header
LB: loop body
LE: loop exit
PB: predicated region body
PF: predicated region fallthrough
CT: control target
= control target key end

     0   :  { %9 = vsyncpa [#allocation3], 0  ;;  %s435_s0 = inlined_call_operand.hbm [shape: f32[16,32], index: 0, kind: input, shape index: {}]   ;;  %s436_s1 = inlined_call_operand.hbm [shape: f32[16,32], index: 1, kind: input, shape index: {}]   ;;  %s437_s2 = inlined_call_operand.hbm [shape: bf16[32,32], index: 2, kind: input, shape index: {}]   ;;  %s438_s3 = inlined_call_operand.hbm [shape: f32[3,32], index: 3, kind: input, shape index: {}]   ;;  %s439_s4 = inlined_call_operand.hbm [shape: f32[16,32], index: 4, kind: output, shape index: {}]  }
   0x1   :  { %10 = vsyncpa [#allocation6], 0 }
   0x2   :  { %11 = vsyncpa [#allocation9], 0 }
   0x3   :  { %12 = vsyncpa [#allocation4], 0  ;;  %s30_s17 = sshll.u32 %s436_s1, 4  ;;  %s367_s18 = smov [#allocation5]   ;;  %s31_s17 = int_to_ptr.hbm [resolvable:$true] %s30_s17 }
   0x4   :  { %s32_s19 = sshll.u32 %s367_s18, 4  ;;  %s17_s22 = sshll.u32 %s435_s0, 4  ;;  %s33_s19 = int_to_ptr.vmem [resolvable:$true] %s32_s19  ;;  %s18_s22 = int_to_ptr.hbm [resolvable:$true] %s17_s22 }
   0x5   :  { %s368_s23 = smov 128   ;;  %s369_s24 = smov 8  }
   0x6   :  { %38 = dma.hbm_to_vmem [thread:$0]  %s31_s17, 256, %s33_s19, [#allocation6], %s368_s23, %s368_s23, %s369_s24  }
   0x7   :  { %s370_s25 = smov [#allocation2]   ;;  %s43_s1 = sshll.u32 %s437_s2, 4  ;;  %s44_s1 = int_to_ptr.hbm [resolvable:$true] %s43_s1 }
   0x8   :  { %s19_s26 = sshll.u32 %s370_s25, 4  ;;  %s371_s0 = smov [#allocation7]   ;;  %s20_s26 = int_to_ptr.vmem [resolvable:$true] %s19_s26 }
   0x9   :  { %25 = dma.hbm_to_vmem [thread:$0]  %s18_s22, 256, %s20_s26, [#allocation3], %s368_s23, %s368_s23, %s369_s24  }
   0xa   :  { %s45_s29 = sshll.u32 %s371_s0, 4  ;;  %s57_s6 = sshll.u32 %s438_s3, 4  ;;  %s46_s29 = int_to_ptr.vmem [resolvable:$true] %s45_s29  ;;  %s58_s6 = int_to_ptr.hbm [resolvable:$true] %s57_s6 }
   0xb   :  { %s372_s7 = smov 64   ;;  %s373_s8 = smov 4  }
   0xc   :  { %51 = dma.hbm_to_vmem [thread:$0]  %s44_s1, 256, %s46_s29, [#allocation6], %s372_s7, %s372_s7, %s373_s8  }
   0xd   :  { %s374_s9 = smov [#allocation8]  }
   0xe   :  { %s59_s10 = sshll.u32 %s374_s9, 4  ;;  %s60_s10 = int_to_ptr.vmem [resolvable:$true] %s59_s10 }
   0xf   :  { %62 = dma.hbm_to_vmem [thread:$0]  %s58_s6, 64, %s60_s10, [#allocation9]  }
  0x10   :  { %359 = dma.done.wait [#allocation3], 256  }
  0x11   :  { %360 = vsyncadd [#allocation3], 4294967040 }
  0x12   :  { %361 = dma.done.wait [#allocation6], 512  }
  0x13   :  { %362 = vsyncadd [#allocation6], 4294966784 }
  0x14   :  { %363 = dma.done.wait [#allocation9], 64  }
  0x15   :  { %364 = vsyncadd [#allocation9], 4294967232  ;;  %vm101_vm0 = vcmask 261120   ;;  %v219_v0 = vld [vmem:[#allocation7 + $0x8] sm:$0xff]  ;;  %v218_v2 = vld [vmem:[#allocation7] sm:$0xff]  ;;  %v375_v18 = vmov 32.0  }
  0x16   :  { %v109_v1 = vsel %vm101_vm0, %v219_v0, 0  ;;  %v106_v3 = vsel %vm101_vm0, %v218_v2, 0  ;;  %v83_v4 = vld [vmem:[#allocation2] sm:$0xff]  ;;  %v84_v5 = vld [vmem:[#allocation2 + $0x8] sm:$0xff]  ;;  %v230_v7 = vld [vmem:[#allocation8] ss:$0 sm:$0xff]  ;;  %233 = vrcp.f32 %v375_v18 }
  0x17   :  { %117 = vmatpush.bf16.xpose.msra.mxu0 %v109_v1  ;;  %v85_v6 = vpack.c.bf16 %v84_v5, %v83_v4  ;;  %v125_v9 = vld [vmem:[#allocation5] sm:$0xff]  ;;  %v126_v14 = vld [vmem:[#allocation5 + $0x8] sm:$0xff]  ;;  %s376_s2 = smov [#allocation10]   ;;  %s194_s13 = sshll.u32 %s439_s4, 4  ;;  %s195_s13 = int_to_ptr.hbm [resolvable:$true] %s194_s13 }
  0x18   :  { %v231_v49 = vld [vmem:[#allocation8 + $0x1] ss:$0 sm:$0xff]  ;;  %v232_v53 = vld [vmem:[#allocation8 + $0x2] ss:$0 sm:$0xff]  ;;  %s192_s3 = sshll.u32 %s376_s2, 4  ;;  %s193_s3 = int_to_ptr.vmem [resolvable:$true] %s192_s3 }
  0x1c   :  { %v234_v19 = vpop.eup %233 }
  0x1d   :  { %v136_v20 = vmul.f32 32.0, %v234_v19  ;;  %vm140_vm1 = vweird.f32 %v234_v19 }
  0x1f   :  { %118 = vmatpush.bf16.xpose.msra.mxu0 %v106_v3  ;;  %v137_v21 = vsub.f32 1.0, %v136_v20 }
  0x21   :  { %v138_v22 = vmul.f32 %v234_v19, %v137_v21 }
  0x23   :  { %v139_v23 = vadd.f32 %v234_v19, %v138_v22 }
  0x25   :  { %v141_v24 = vsel %vm140_vm1, %v234_v19, %v139_v23 }
  0x26   :  { %217 = vmatmul.msk.bf16.vlgmr.msra.gmra.mxu0 %vm101_vm0, %v85_v6 }
  0xa3   :  { %v120_v8 = vpop.f32.mrf.mxu0 }
  0xa4   :  { %v121_v10 = vadd.f32 %v230_v7, %v120_v8 }
  0xa6   :  { %v127_v11 = vadd.f32 %v125_v9, %v121_v10 }
  0xa8   :  { %v129_v12 = vsel %vm101_vm0, %v127_v11, 0.0 }
  0xa9   :  { %130 = vadd.xlane.f32.xlu0 %v129_v12 }
  0xab   :  { %v122_v13 = vpop.f32.mrf.mxu0 }
  0xac   :  { %v123_v15 = vadd.f32 %v230_v7, %v122_v13 }
  0xae   :  { %v128_v16 = vadd.f32 %v126_v14, %v123_v15 }
  0xb0   :  { %v132_v17 = vsel %vm101_vm0, %v128_v16, 0.0 }
  0xb1   :  { %133 = vadd.xlane.f32.xlu0 %v132_v17 }
 0x11c   :  { %v131_v25 = vpop.xlane.xlu0 %130 }
 0x11d   :  { %v142_v26 = vmul.f32 %v141_v24, %v131_v25 }
 0x11f   :  { %v144_v27 = vsub.f32 %v127_v11, %v142_v26 }
 0x121   :  { %v146_v28 = vmul.f32 %v144_v27, %v144_v27 }
 0x123   :  { %v148_v29 = vsel %vm101_vm0, %v146_v28, 0.0 }
 0x124   :  { %149 = vadd.xlane.f32.xlu1 %v148_v29  ;;  %v134_v30 = vpop.xlane.xlu0 %133 }
 0x125   :  { %v143_v31 = vmul.f32 %v141_v24, %v134_v30 }
 0x127   :  { %v145_v32 = vsub.f32 %v128_v16, %v143_v31 }
 0x129   :  { %v147_v33 = vmul.f32 %v145_v32, %v145_v32 }
 0x12b   :  { %v151_v34 = vsel %vm101_vm0, %v147_v33, 0.0 }
 0x12c   :  { %152 = vadd.xlane.f32.xlu1 %v151_v34 }
 0x197   :  { %v150_v35 = vpop.xlane.xlu1 %149 }
 0x198   :  { %v154_v36 = vmul.f32 %v150_v35, %v141_v24 }
 0x19a   :  { %v156_v37 = vadd.f32 1e-12, %v154_v36 }
 0x19c   :  { %235 = vrsqrt.f32 %v156_v37  ;;  %vm164_vm3 = vweird.f32 %v156_v37 }
 0x19f   :  { %v153_v38 = vpop.xlane.xlu1 %152 }
 0x1a0   :  { %v155_v39 = vmul.f32 %v153_v38, %v141_v24 }
 0x1a2   :  { %v236_v40 = vpop.eup %235  ;;  %v157_v41 = vadd.f32 1e-12, %v155_v39 }
 0x1a3   :  { %v159_v42 = vmul.f32 %v236_v40, %v156_v37  ;;  %vm165_vm2 = vweird.f32 %v236_v40 }
 0x1a4   :  { %237 = vrsqrt.f32 %v157_v41  ;;  %vm166_vm4 = vmor %vm164_vm3, %vm165_vm2  ;;  %vm174_vm6 = vweird.f32 %v157_v41 }
 0x1a5   :  { %v160_v43 = vmul.f32 %v236_v40, %v159_v42 }
 0x1a7   :  { %v161_v44 = vmul.f32 0.5, %v160_v43 }
 0x1a9   :  { %v162_v45 = vsub.f32 1.5, %v161_v44 }
 0x1aa   :  { %v238_v46 = vpop.eup %237 }
 0x1ab   :  { %v163_v47 = vmul.f32 %v236_v40, %v162_v45  ;;  %v169_v48 = vmul.f32 %v238_v46, %v157_v41  ;;  %vm175_vm5 = vweird.f32 %v238_v46 }
 0x1ac   :  { %vm176_vm7 = vmor %vm174_vm6, %vm175_vm5 }
 0x1ad   :  { %v167_v50 = vsel %vm166_vm4, %v236_v40, %v163_v47  ;;  %v170_v51 = vmul.f32 %v238_v46, %v169_v48 }
 0x1ae   :  { %v178_v52 = vmul.f32 %v167_v50, %v144_v27 }
 0x1af   :  { %v171_v54 = vmul.f32 0.5, %v170_v51 }
 0x1b0   :  { %v181_v55 = vmul.f32 %v231_v49, %v178_v52 }
 0x1b1   :  { %v172_v56 = vsub.f32 1.5, %v171_v54 }
 0x1b2   :  { %v184_v57 = vadd.f32 %v232_v53, %v181_v55 }
 0x1b3   :  { %v173_v58 = vmul.f32 %v238_v46, %v172_v56 }
 0x1b4   :  { %186 = vst.msk [vmem:[#allocation10] sm:$0xff] %vm101_vm0, %v184_v57 }
 0x1b5   :  { %v177_v59 = vsel %vm176_vm7, %v238_v46, %v173_v58 }
 0x1b6   :  { %v179_v60 = vmul.f32 %v177_v59, %v145_v32 }
 0x1b8   :  { %v182_v61 = vmul.f32 %v231_v49, %v179_v60 }
 0x1ba   :  { %v185_v62 = vadd.f32 %v232_v53, %v182_v61 }
 0x1bc   :  { %187 = vst.msk [vmem:[#allocation10 + $0x8] sm:$0xff] %vm101_vm0, %v185_v62 }
 0x1bd   :  { %200 = dma.vmem_to_hbm [thread:$0]  %s193_s3, 256, %s195_s13, [#allocation4], %s368_s23, %s368_s23, %s369_s24  }
 0x1be   :  { %365 = dma.done.wait [#allocation4], 256  }
 0x1bf   :  { %366 = vsyncadd [#allocation4], 4294967040 }
 0x1c0   :  { %205 = vsyncpa [#allocation3], 1 }
 0x1c1   :  { %206 = vsyncpa [#allocation6], 1 }
 0x1c2   :  { %207 = vsyncpa [#allocation9], 1 }
 0x1c3   :  { %208 = vsyncpa [#allocation4], 1 }

</bundles_post_ra>
